<compile_context>
chip_gen: v6e
topology: v6e:2x2x1
jax: 0.10.0
libtpu: 0.0.40
codegen_flags: <defaults>
</compile_context>

<pallas_src>
import jax
import jax.numpy as jnp
from jax.experimental import pallas as pl
from jax.experimental.pallas import tpu as pltpu

KH = KW = 3  # 3x3 conv, padding=1, stride=1


def conv_relu_kernel(p_ref, w_ref, b_ref, o_ref):
    """Fused im2col-matmul + bias + ReLU, NCHW-flattened lane-dense output.

    p_ref: (B, K, HW)   im2col patches, K = C*KH*KW, HW = H*W (lane axis)
    w_ref: (OC, K)      packed conv weights (c-major, (kh,kw)-minor) — matches p_ref
    b_ref: (OC, 1)      bias
    o_ref: (B, OC, HW)  output, already in NCHW-flatten order (oc, h, w)
    """
    w = w_ref[...]          # (OC, K)   tiny, stays in vregs
    bias = b_ref[...]       # (OC, 1)
    B = o_ref.shape[0]      # small static batch block -> unrolled
    for i in range(B):
        # Single MXU push per batch element: (OC,K) x (K,HW) -> (OC,HW).
        acc = jnp.dot(w, p_ref[i], preferred_element_type=jnp.float32)
        o_ref[i] = jnp.maximum(acc + bias, 0.0).astype(o_ref.dtype)


def feature_extractor_forward(x_nchw, w_oihw, bias, *, batch_block=None):
    """Pallas implementation of FeatureExtractor.forward.

    x_nchw: (N, C, H, W) float32
    w_oihw: (OC, C, KH, KW) float32
    bias:   (OC,) float32
    returns (N, OC*H*W) float32, flattened in PyTorch NCHW order.
    """
    N, C, H, W = x_nchw.shape
    OC = w_oihw.shape[0]
    K = C * KH * KW
    HW = H * W

    # Keep >= 2 grid steps (so both v7x TensorCores get work), but block
    # batches per step when N is large to amortize per-step overhead.
    if batch_block is None:
        batch_block = N // 2 if (N > 2 and N % 2 == 0) else 1
    assert N % batch_block == 0, "batch_block must divide N"

    # ---- single fused repack (one pass over the tiny activation tensor) ----
    # NCHW -> zero-padded -> im2col with reduction axis ordered (c, kh, kw)
    # and spatial (h*W + w) on the fast/lane axis.
    x_pad = jnp.pad(x_nchw, ((0, 0), (0, 0), (1, 1), (1, 1)))          # (N,C,H+2,W+2)
    cols = [x_pad[:, :, kh:kh + H, kw:kw + W]                          # (N,C,H,W) each
            for kh in range(KH) for kw in range(KW)]
    patches = jnp.stack(cols, axis=2).reshape(N, K, HW)                # (N, C*9, H*W)

    # (OC, C, KH, KW) -> (OC, C*KH*KW): c-major, (kh,kw)-minor — matches patches.
    w_pack = w_oihw.reshape(OC, K)
    b_pack = bias.reshape(OC, 1)

    out = pl.pallas_call(
        conv_relu_kernel,
        out_shape=jax.ShapeDtypeStruct((N, OC, HW), jnp.float32),
        grid_spec=pltpu.PrefetchScalarGridSpec(
            num_scalar_prefetch=0,
            grid=(N // batch_block,),
            in_specs=[
                pl.BlockSpec((batch_block, K, HW), lambda n: (n, 0, 0)),
                pl.BlockSpec((OC, K), lambda n: (0, 0)),
                pl.BlockSpec((OC, 1), lambda n: (0, 0)),
            ],
            out_specs=pl.BlockSpec((batch_block, OC, HW), lambda n: (n, 0, 0)),
        ),
        compiler_params=pltpu.CompilerParams(
            dimension_semantics=("parallel",),
        ),
    )(patches, w_pack, b_pack)

    # Output is already (oc-major, h, w) per batch element == torch NCHW .view(bs,-1).
    return out.reshape(N, OC * HW)


def reference_forward(x_nchw, w_oihw, bias):
    """Pure-JAX reference (mirrors torch Conv2d(pad=1) + ReLU + view)."""
    y = jax.lax.conv_general_dilated(
        x_nchw, w_oihw,
        window_strides=(1, 1), padding=((1, 1), (1, 1)),
        dimension_numbers=("NCHW", "OIHW", "NCHW"),
    )
    y = y + bias.reshape(1, -1, 1, 1)
    y = jnp.maximum(y, 0.0)
    return y.reshape(x_nchw.shape[0], -1)


if __name__ == "__main__":
    # Small deterministic setup: batch=2, C_in=4, spatial=16x16, C_out=8.
    key = jax.random.PRNGKey(0)
    kx, kw, kb = jax.random.split(key, 3)

    N, C, H, W, OC = 2, 4, 16, 16, 8
    x = jax.random.normal(kx, (N, C, H, W), dtype=jnp.float32)
    w = jax.random.normal(kw, (OC, C, KH, KW), dtype=jnp.float32) * 0.1
    b = jax.random.normal(kb, (OC,), dtype=jnp.float32) * 0.1

    # TODO(synk): the PyTorch module wraps an *arbitrary* backbone; only this
    # fixed Conv3x3+ReLU backbone is implemented here (.eval() is a no-op for it).
    fwd = jax.jit(feature_extractor_forward)
    feats = jax.block_until_ready(fwd(x, w, b))

    ref = reference_forward(x, w, b)
    assert feats.shape == (N, OC * H * W), feats.shape
    assert jnp.allclose(feats, ref, atol=1e-4, rtol=1e-4), "mismatch vs reference"

    print("KERNEL_OK")
</pallas_src>

<mosaic_0001>
module attributes {stable_mosaic.version = 11 : i64} {
  func.func @conv_relu_kernel(%arg0: i32, %arg1: memref<1x36x256xf32, #tpu.memory_space<vmem>>, %arg2: memref<8x36xf32, #tpu.memory_space<vmem>>, %arg3: memref<8x1xf32, #tpu.memory_space<vmem>>, %arg4: memref<1x8x256xf32, #tpu.memory_space<vmem>>) attributes {dimension_semantics = [#tpu.dimension_semantics<parallel>], iteration_bounds = array<i64: 2>, scalar_prefetch = 0 : i64, scratch_operands = 0 : i64, tpu.core_type = #tpu.core_type<tc>, window_params = [{transform_indices = @transform_0, window_bounds = array<i64: 1, 36, 256>}, {pipeline_mode = #tpu.pipeline_mode<synchronous>, transform_indices = @transform_1, window_bounds = array<i64: 8, 36>}, {pipeline_mode = #tpu.pipeline_mode<synchronous>, transform_indices = @transform_2, window_bounds = array<i64: 8, 1>}, {transform_indices = @transform_3, window_bounds = array<i64: 1, 8, 256>}]} {
    %c0 = arith.constant 0 : index
    %c0_0 = arith.constant 0 : index
    %0 = vector.load %arg2[%c0, %c0_0] : memref<8x36xf32, #tpu.memory_space<vmem>>, vector<8x36xf32>
    %c0_1 = arith.constant 0 : index
    %c0_2 = arith.constant 0 : index
    %1 = vector.load %arg3[%c0_1, %c0_2] : memref<8x1xf32, #tpu.memory_space<vmem>>, vector<8x1xf32>
    %c0_3 = arith.constant 0 : index
    %c0_4 = arith.constant 0 : index
    %c0_5 = arith.constant 0 : index
    %2 = vector.load %arg1[%c0_3, %c0_4, %c0_5] : memref<1x36x256xf32, #tpu.memory_space<vmem>>, vector<1x36x256xf32>
    %3 = vector.shape_cast %2 : vector<1x36x256xf32> to vector<36x256xf32>
    %cst = arith.constant dense<0.000000e+00> : vector<8x256xf32>
    %4 = tpu.matmul %0, %3, %cst {dimension_numbers = #tpu.dot_dimension_numbers<[1], [0], [0], [1], [0, 0, 1, 1], [], []>} : vector<8x36xf32>, vector<36x256xf32>, vector<8x256xf32> -> vector<8x256xf32>
    %5 = vector.broadcast %1 : vector<8x1xf32> to vector<8x256xf32>
    %6 = arith.addf %4, %5 : vector<8x256xf32>
    %cst_6 = arith.constant 0.000000e+00 : f32
    %7 = vector.broadcast %cst_6 : f32 to vector<8x256xf32>
    %8 = arith.maximumf %6, %7 : vector<8x256xf32>
    %c0_7 = arith.constant 0 : index
    %c0_8 = arith.constant 0 : index
    %c0_9 = arith.constant 0 : index
    %9 = vector.load %arg4[%c0_7, %c0_8, %c0_9] : memref<1x8x256xf32, #tpu.memory_space<vmem>>, vector<1x8x256xf32>
    %10 = vector.shape_cast %9 : vector<1x8x256xf32> to vector<8x256xf32>
    %11 = vector.shape_cast %8 : vector<8x256xf32> to vector<1x8x256xf32>
    tpu.vector_store %arg4[%c0_7, %c0_8, %c0_9], %11 {strides = array<i32>} : memref<1x8x256xf32, #tpu.memory_space<vmem>>, vector<1x8x256xf32>,
    return
  }
  func.func @transform_0(%arg0: i32) -> (i32, i32, i32) {
    %c0_i32 = arith.constant 0 : i32
    %c0_i32_0 = arith.constant 0 : i32
    %c0_i32_1 = arith.constant 0 : i32
    return %arg0, %c0_i32, %c0_i32_0 : i32, i32, i32
  }
  func.func @transform_1(%arg0: i32) -> (i32, i32) {
    %c0_i32 = arith.constant 0 : i32
    %c0_i32_0 = arith.constant 0 : i32
    %c0_i32_1 = arith.constant 0 : i32
    return %c0_i32, %c0_i32_0 : i32, i32
  }
  func.func @transform_2(%arg0: i32) -> (i32, i32) {
    %c0_i32 = arith.constant 0 : i32
    %c0_i32_0 = arith.constant 0 : i32
    %c0_i32_1 = arith.constant 0 : i32
    return %c0_i32, %c0_i32_0 : i32, i32
  }
  func.func @transform_3(%arg0: i32) -> (i32, i32, i32) {
    %c0_i32 = arith.constant 0 : i32
    %c0_i32_0 = arith.constant 0 : i32
    %c0_i32_1 = arith.constant 0 : i32
    return %arg0, %c0_i32, %c0_i32_0 : i32, i32, i32
  }
}

</mosaic_0001>

<bundles_post_ra>
// kernel: feature_extractor_forward.1
= control target key start
LH: loop header
LB: loop body
LE: loop exit
PB: predicated region body
PF: predicated region fallthrough
CT: control target
= control target key end

     0   :  { %s385_s12 = smov 0   ;;  %s412_s0 = inlined_call_operand.vmem [shape: f32[2,36,256], index: 0, kind: input, shape index: {}]   ;;  %s413_s1 = inlined_call_operand.vmem [shape: f32[8,36], index: 1, kind: input, shape index: {}]   ;;  %s414_s2 = inlined_call_operand.vmem [shape: f32[8,1], index: 2, kind: input, shape index: {}]   ;;  %s415_s3 = inlined_call_operand.vmem [shape: f32[2,8,256], index: 3, kind: output, shape index: {}]  }
   0x1 LB: > { %s329_s13 = sadd.s32 4294967295, %s361_s12   ;;  %p333_p0 = scmp.ge.s32.totalorder %s361_s12, 1  ;;  %s361_s12 = sphi %s385_s12, %s13_s12  }
   0x2   : > { %p137_p1 = scmp.lt.s32.totalorder %s361_s12, 3 }
   0x4   : > { %p138_p2 = pnand %p333_p0, %p137_p1 }
   0x5   : > { %p161_p3 = scmp.lt.s32.totalorder (!%p138_p2), %s329_s13, 1 }
   0x6   : > { %141 = sbr.rel (%p138_p2) target bundleno = 226 (0xe2), region = 32 }
   0xb   : > { %v363_v0 = vmov 0.0   ;;  %v364_v1 = vmov 0   ;;  %v172_v2 = vld [vmem:[%s414_s2] sm:$0xff]  ;;  %s417_s13 = smov (!%p161_p3, %s329_s13), 1  ;;  %vm192_vm0 = vcmask 1043456   ;;  %vm188_vm1 = vcmask 293888  }
   0xc   : > { %263 = vmatprep.mubr.f32.mxu0 %v363_v0  ;;  %354 = vset.pattern.permute.xlu0 %v364_v1  ;;  %s343_s16 = smul.u32 80, %s417_s13  ;;  %v171_v13 = vld [vmem:[%s413_s1] sm:$0xff]  ;;  %s342_s22 = sshll.u32 %s417_s13, 4 }
   0xd   : > { %185 = vperm.xlu0 %354, %v172_v2   ;;  %s170_s25 = scalar_lea.vmem %s415_s3, %s342_s22 }
   0xe   : > { %s165_s19 = scalar_lea.vmem %s412_s0, %s343_s16 }
   0xf   : > { %v182_v3 = vld [vmem:[%s165_s19 + $0x48] sm:$0xf]  ;;  %v181_v4 = vld [vmem:[%s165_s19 + $0x40] sm:$0xf]  ;;  %v180_v5 = vld [vmem:[%s165_s19 + $0x38] sm:$0xff] }
  0x10   : > { %337 = vmatprep.subr.msk.mxu0 %vm192_vm0, %v182_v3  ;;  %v179_v6 = vld [vmem:[%s165_s19 + $0x30] sm:$0xff]  ;;  %v178_v7 = vld [vmem:[%s165_s19 + $0x28] sm:$0xff]  ;;  %v177_v8 = vld [vmem:[%s165_s19 + $0x20] sm:$0xff] }
  0x11   : > { %338 = vmatpush1.msk.msra.mxu0 %vm192_vm0, %v181_v4  ;;  %v176_v9 = vld [vmem:[%s165_s19 + $0x18] sm:$0xff]  ;;  %v175_v10 = vld [vmem:[%s165_s19 + $0x10] sm:$0xff]  ;;  %v174_v11 = vld [vmem:[%s165_s19 + $0x8] sm:$0xff] }
  0x12   : > { %223 = vmatprep.subr.mxu0 %v180_v5  ;;  %v173_v12 = vld [vmem:[%s165_s19] sm:$0xff] }
  0x13   : > { %224 = vmatpush1.msra.mxu0 %v179_v6 }
  0x14   : > { %225 = vmatprep.subr.mxu0 %v178_v7 }
  0x15   : > { %226 = vmatpush1.msra.mxu0 %v177_v8 }
  0x16   : > { %227 = vmatprep.subr.mxu0 %v176_v9 }
  0x17   : > { %228 = vmatpush1.msra.mxu0 %v175_v10 }
  0x18   : > { %229 = vmatprep.subr.mxu0 %v174_v11 }
  0x19   : > { %230 = vmatpush1.msra.mxu0 %v173_v12 }
  0x1a   : > { %339 = vmatmul.mubr.msk.f32.vlgmr.msra.gmra.mxu0 %vm188_vm1, %v171_v13 }
  0x88   : > { %v186_v14 = vpop.permute.xlu0 %185 }
  0xda   : > { %v265_v15 = vpop.f32.mrf.mxu0 }
  0xdb   : > { %v266_v16 = vadd.f32 %v265_v15, %v186_v14 }
  0xdc   : > { %v267_v17 = vpop.f32.mrf.mxu0 }
  0xdd   : > { %v270_v18 = vmax.f32 %v266_v16, 0.0  ;;  %v268_v19 = vadd.f32 %v267_v17, %v186_v14 }
  0xdf   : > { %272 = vst [vmem:[%s170_s25] sm:$0xff] %v270_v18  ;;  %v271_v20 = vmax.f32 %v268_v19, 0.0 }
  0xe1   : > { %273 = vst [vmem:[%s170_s25 + $0x8] sm:$0xff] %v271_v20 }
  0xe2 PF: > { %s13_s12 = sadd.s32 1, %s361_s12  }
  0xe3   : > { %p10_p4 = scmp.ge.s32.totalorder %s13_s12, 4  }
  0xe5   :  { %12 = sbr.rel (!%p10_p4) target bundleno = 1 (0x1), region = 62 }

</bundles_post_ra>
